<compile_context>
chip_gen: v6e
topology: v6e:2x2x1
jax: 0.10.0
libtpu: 0.0.40
codegen_flags: <defaults>
</compile_context>

<pallas_src>
import numpy as np
import jax
import jax.numpy as jnp
from jax import lax
from jax.experimental import pallas as pl
from jax.experimental.pallas import tpu as pltpu


# ---------------------------- tuning knobs ---------------------------------
_VPU_MAX_IN = 8                 # C   <= this and ...
_VPU_MAX_OUT = 16               # OUT <= this -> unrolled VPU FMA, else MXU
_TN_MAX = 1024                  # max lane-tile width (bounds per-row vregs)
_STEP_BYTES_TARGET = 4 << 20    # target in+out HBM traffic per grid step
_VMEM_DATA_BUDGET = 12 << 20    # double-buffered in+out blocks must fit this
_VMEM_LIMIT_BYTES = 32 << 20    # scoped VMEM limit; <= physical on v5e/v6e/v7x


# --------------------- lane-major path (dim != last) -----------------------
def _lane_major_kernel(x_ref, w_ref, b_ref, o_ref):
    """y[l, o, t] = sum_c w[o, c] * x[l, c, t] + b[o].

    x_ref: (BL, C, TN)  w_ref: (OUT, C)  b_ref: (OUT, 1)  o_ref: (BL, OUT, TN)
    Features sit on sublanes, the large T axis sits on lanes (lane-dense
    loads and stores); the tiny weight/bias stay resident in VMEM.
    """
    BL, C, TN = x_ref.shape
    OUT = w_ref.shape[0]
    use_vpu = (C <= _VPU_MAX_IN) and (OUT <= _VPU_MAX_OUT)

    b32 = b_ref[...].astype(jnp.float32)            # (OUT, 1)
    if use_vpu:
        w32 = w_ref[...].astype(jnp.float32)        # (OUT, C), tiny

    # Per-row loop (not a static Python for): bounds vreg live ranges to one
    # row's (OUT, TN) accumulator plus one (C, TN) native-dtype row.
    @pl.loop(0, BL)
    def _(l):
        xl = x_ref[l]                               # (C, TN), native dtype
        if use_vpu:
            # Unrolled broadcast-FMA on the VPU: C ops over an (OUT, TN)
            # tile; one row slice is cast to f32 per use (no full f32 copy).
            acc = w32[:, 0:1] * xl[0:1, :].astype(jnp.float32)
            for c in range(1, C):
                acc = acc + w32[:, c:c + 1] * xl[c:c + 1, :].astype(jnp.float32)
        else:
            # Larger feature dims: real matmul on the MXU.
            acc = jnp.dot(w_ref[...], xl, preferred_element_type=jnp.float32)
        o_ref[l] = (acc + b32).astype(o_ref.dtype)


def _choose_lane_major_tiles(L, C, T, OUT, itemsize):
    """Pick (BL, tn) targeting a few MiB per step within the VMEM budget."""
    tn = T if T <= _TN_MAX else _TN_MAX
    row_bytes = (C + OUT) * tn * itemsize            # in+out for one l-row
    bl = max(1, min(L, _STEP_BYTES_TARGET // max(row_bytes, 1)))
    # Double-buffered input + output blocks must fit the VMEM data budget.
    bl = min(bl, max(1, _VMEM_DATA_BUDGET // max(2 * row_bytes, 1)))
    n_t = -(-T // tn)
    # Keep >= 2 grid steps when possible so both v7x TensorCores get work.
    if n_t == 1 and bl >= L and L >= 2:
        bl = (L + 1) // 2
    return int(bl), int(tn)


def _linear_lane_major(x3, w, b):
    """x3: (L, C, T) -> (L, OUT, T), y[l,o,t] = sum_c w[o,c] x[l,c,t] + b[o]."""
    L, C, T = x3.shape
    OUT = w.shape[0]
    bl, tn = _choose_lane_major_tiles(L, C, T, OUT, x3.dtype.itemsize)
    grid = (-(-L // bl), -(-T // tn))
    b2 = b.reshape(OUT, 1)

    cost = pl.CostEstimate(
        flops=2 * L * OUT * C * T + L * OUT * T,
        transcendentals=0,
        bytes_accessed=(L * C * T + L * OUT * T) * x3.dtype.itemsize
        + (OUT * C + OUT) * w.dtype.itemsize,
    )

    return pl.pallas_call(
        _lane_major_kernel,
        out_shape=jax.ShapeDtypeStruct((L, OUT, T), x3.dtype),
        grid_spec=pltpu.PrefetchScalarGridSpec(
            num_scalar_prefetch=0,
            grid=grid,
            in_specs=[
                pl.BlockSpec((bl, C, tn), lambda l, t: (l, 0, t)),
                pl.BlockSpec((OUT, C), lambda l, t: (0, 0)),   # tiny, resident
                pl.BlockSpec((OUT, 1), lambda l, t: (0, 0)),   # tiny, resident
            ],
            out_specs=pl.BlockSpec((bl, OUT, tn), lambda l, t: (l, 0, t)),
        ),
        compiler_params=pltpu.CompilerParams(
            dimension_semantics=("parallel", "parallel"),
            vmem_limit_bytes=_VMEM_LIMIT_BYTES,
        ),
        cost_estimate=cost,
    )(x3, w, b2)


# ------------------- features-last path (dim == last) ----------------------
def _features_last_matmul_kernel(x_ref, w_ref, b_ref, o_ref, acc_ref):
    """One (tm, tn) output tile accumulated over the K grid axis.

    x_ref: (tm, tk)  w_ref: (tn, tk)  b_ref: (1, tn)  o_ref: (tm, tn)
    acc_ref: (tm, tn) f32 scratch, resident across the K axis.
    """
    k = pl.program_id(2)

    @pl.when(k == 0)
    def _():
        acc_ref[...] = jnp.zeros_like(acc_ref)

    acc_ref[...] += lax.dot_general(
        x_ref[...], w_ref[...],
        dimension_numbers=(((1,), (1,)), ((), ())),   # contract K; no w.T copy
        preferred_element_type=jnp.float32,
    )

    @pl.when(k == pl.num_programs(2) - 1)
    def _():
        o_ref[...] = (acc_ref[...] + b_ref[...].astype(jnp.float32)
                      ).astype(o_ref.dtype)


def _pick_tk(K):
    # K is the contraction axis: its tile must divide K exactly (tail blocks
    # along K would pollute the accumulator).  Callers guarantee K % 128 == 0.
    for cand in (512, 256, 128):
        if K % cand == 0:
            return cand
    return K


def _linear_features_last(x2, w, b):
    """x2: (M, K) -> (M, N) = x2 @ w.T + b, tiled over (M, N, K)."""
    M, K = x2.shape
    N = w.shape[0]
    tm = M if M <= 256 else 256
    tn = N if N <= 256 else 256
    tk = _pick_tk(K)
    grid = (-(-M // tm), -(-N // tn), K // tk)
    b2 = b.reshape(1, N)

    cost = pl.CostEstimate(
        flops=2 * M * N * K + M * N,
        transcendentals=0,
        bytes_accessed=(M * K + M * N) * x2.dtype.itemsize
        + (N * K + N) * w.dtype.itemsize,
    )

    return pl.pallas_call(
        _features_last_matmul_kernel,
        out_shape=jax.ShapeDtypeStruct((M, N), x2.dtype),
        grid_spec=pltpu.PrefetchScalarGridSpec(
            num_scalar_prefetch=0,
            grid=grid,
            in_specs=[
                pl.BlockSpec((tm, tk), lambda i, j, k: (i, k)),
                pl.BlockSpec((tn, tk), lambda i, j, k: (j, k)),
                pl.BlockSpec((1, tn), lambda i, j, k: (0, j)),
            ],
            out_specs=pl.BlockSpec((tm, tn), lambda i, j, k: (i, j)),
            scratch_shapes=[pltpu.VMEM((tm, tn), jnp.float32)],
        ),
        compiler_params=pltpu.CompilerParams(
            dimension_semantics=("parallel", "parallel", "arbitrary"),
            vmem_limit_bytes=_VMEM_LIMIT_BYTES,
        ),
        cost_estimate=cost,
    )(x2, w, b2)


# ----------------------------- dispatch -------------------------------------
def _xla_linear_in_dim(x, w, b, d):
    """Plain-XLA fallback for shapes where a Pallas kernel cannot win
    (lane-sparse outputs / tiny tiles)."""
    perm = list(range(x.ndim))
    perm[-1], perm[d] = perm[d], perm[-1]        # swap is its own inverse
    xt = jnp.transpose(x, perm)
    yt = jnp.einsum("...k,ok->...o", xt, w) + b
    return jnp.transpose(yt, perm)


def liner_in_dim(x, w, b, dim=-1):
    """JAX/Pallas equivalent of LinerInDim.forward.

    x: arbitrary-rank array with x.shape[dim] == in_size
    w: (out_size, in_size)   (PyTorch nn.Linear weight layout)
    b: (out_size,)
    """
    nd = x.ndim
    d = dim % nd
    out_size, in_size = w.shape
    assert x.shape[d] == in_size, (x.shape, d, in_size)

    if d == nd - 1:
        lead = x.shape[:-1]
        M = int(np.prod(lead)) if lead else 1
        # Pallas matmul path only when tiles can be lane-dense and the K
        # contraction axis tiles exactly; otherwise XLA beats masked stores.
        if in_size % 128 == 0 and out_size % 128 == 0 and M >= 8:
            y2 = _linear_features_last(x.reshape(M, in_size), w, b)
            return y2.reshape(*lead, out_size)
        return _xla_linear_in_dim(x, w, b, d)

    # General case: pure reshape (no HBM relayout) to (L, C, T); the kernel
    # contracts the C (sublane) axis directly, so the channels-last transpose
    # and its inverse from the original module are never materialized.
    L = int(np.prod(x.shape[:d])) if d > 0 else 1
    T = int(np.prod(x.shape[d + 1:]))
    if T < 128:
        # Lane tile would itself be lane-sparse; fixed pallas_call overhead
        # dominates -> plain XLA.
        return _xla_linear_in_dim(x, w, b, d)
    y3 = _linear_lane_major(x.reshape(L, in_size, T), w, b)
    return y3.reshape(*x.shape[:d], out_size, *x.shape[d + 1:])


# ------------------------------- demo ---------------------------------------
if __name__ == "__main__":
    key = jax.random.PRNGKey(0)
    kx, kw, kb, kx2, kw2, kb2, kx3 = jax.random.split(key, 7)

    # Case 1: NCHW input, linear over the channel axis (dim=1) — lane-major
    # Pallas path with the VPU-unroll branch.
    B, C, H, W_sp = 2, 4, 16, 16
    in_size, out_size = C, 8
    x = jax.random.normal(kx, (B, C, H, W_sp), dtype=jnp.float32)
    bound = 1.0 / np.sqrt(in_size)
    w = jax.random.uniform(kw, (out_size, in_size), jnp.float32, -bound, bound)
    b = jax.random.uniform(kb, (out_size,), jnp.float32, -bound, bound)

    y = liner_in_dim(x, w, b, dim=1)
    jax.block_until_ready(y)
    assert y.shape == (B, out_size, H, W_sp), y.shape
    ref = jnp.einsum("bchw,oc->bohw", x, w) + b[None, :, None, None]
    np.testing.assert_allclose(np.asarray(y), np.asarray(ref),
                               rtol=1e-5, atol=1e-5)

    # Case 2: dim=-1 with MXU-friendly feature sizes — tiled (M,N,K) Pallas
    # matmul path (3 K-steps exercise the accumulator init/finalize).
    B2, S2, IN2, OUT2 = 2, 16, 384, 128
    x2 = jax.random.normal(kx2, (B2, S2, IN2), dtype=jnp.float32)
    bound2 = 1.0 / np.sqrt(IN2)
    w2 = jax.random.uniform(kw2, (OUT2, IN2), jnp.float32, -bound2, bound2)
    b2 = jax.random.uniform(kb2, (OUT2,), jnp.float32, -bound2, bound2)
    y2 = liner_in_dim(x2, w2, b2, dim=-1)
    jax.block_until_ready(y2)
    assert y2.shape == (B2, S2, OUT2), y2.shape
    ref2 = jnp.einsum("bsk,ok->bso", x2, w2) + b2
    # Loose tolerance: MXU f32 matmul at default precision may use bf16 passes.
    np.testing.assert_allclose(np.asarray(y2), np.asarray(ref2),
                               rtol=2e-2, atol=2e-2)

    # Case 3: dim=-1 with tiny features — intentionally routed to the XLA
    # fallback (lane-sparse Pallas stores would lose here, per review).
    x3 = jax.random.normal(kx3, (B, H, W_sp, C), dtype=jnp.float32)
    y3 = liner_in_dim(x3, w, b, dim=-1)
    jax.block_until_ready(y3)
    ref3 = jnp.einsum("bhwc,oc->bhwo", x3, w) + b
    np.testing.assert_allclose(np.asarray(y3), np.asarray(ref3),
                               rtol=1e-5, atol=1e-5)

    print("KERNEL_OK")
</pallas_src>

<mosaic_0001>
module attributes {stable_mosaic.version = 11 : i64} {
  func.func @_lane_major_kernel(%arg0: i32, %arg1: i32, %arg2: memref<1x4x256xf32, #tpu.memory_space<vmem>>, %arg3: memref<8x4xf32, #tpu.memory_space<vmem>>, %arg4: memref<8x1xf32, #tpu.memory_space<vmem>>, %arg5: memref<1x8x256xf32, #tpu.memory_space<vmem>>) attributes {dimension_semantics = [#tpu.dimension_semantics<parallel>, #tpu.dimension_semantics<parallel>], iteration_bounds = array<i64: 2, 1>, scalar_prefetch = 0 : i64, scratch_operands = 0 : i64, tpu.core_type = #tpu.core_type<tc>, window_params = [{transform_indices = @transform_0, window_bounds = array<i64: 1, 4, 256>}, {pipeline_mode = #tpu.pipeline_mode<synchronous>, transform_indices = @transform_1, window_bounds = array<i64: 8, 4>}, {pipeline_mode = #tpu.pipeline_mode<synchronous>, transform_indices = @transform_2, window_bounds = array<i64: 8, 1>}, {transform_indices = @transform_3, window_bounds = array<i64: 1, 8, 256>}]} {
    %c0 = arith.constant 0 : index
    %c0_0 = arith.constant 0 : index
    %0 = vector.load %arg4[%c0, %c0_0] : memref<8x1xf32, #tpu.memory_space<vmem>>, vector<8x1xf32>
    %c0_1 = arith.constant 0 : index
    %c0_2 = arith.constant 0 : index
    %1 = vector.load %arg3[%c0_1, %c0_2] : memref<8x4xf32, #tpu.memory_space<vmem>>, vector<8x4xf32>
    %c0_i32 = arith.constant 0 : i32
    %c1_i32 = arith.constant 1 : i32
    %2 = arith.muli %c0_i32, %c1_i32 : i32
    %c0_i32_3 = arith.constant 0 : i32
    %3 = arith.addi %c0_i32_3, %2 : i32
    %4 = arith.index_cast %3 : i32 to index
    %c0_4 = arith.constant 0 : index
    %c0_5 = arith.constant 0 : index
    %5 = vector.load %arg2[%4, %c0_4, %c0_5] : memref<1x4x256xf32, #tpu.memory_space<vmem>>, vector<1x4x256xf32>
    %6 = vector.shape_cast %5 : vector<1x4x256xf32> to vector<4x256xf32>
    %7 = vector.extract_strided_slice %1 {offsets = [0, 0], sizes = [8, 1], strides = [1, 1]} : vector<8x4xf32> to vector<8x1xf32>
    %8 = vector.extract_strided_slice %6 {offsets = [0, 0], sizes = [1, 256], strides = [1, 1]} : vector<4x256xf32> to vector<1x256xf32>
    %9 = vector.broadcast %7 : vector<8x1xf32> to vector<8x256xf32>
    %10 = vector.broadcast %8 : vector<1x256xf32> to vector<8x256xf32>
    %11 = arith.mulf %9, %10 : vector<8x256xf32>
    %12 = vector.extract_strided_slice %1 {offsets = [0, 1], sizes = [8, 1], strides = [1, 1]} : vector<8x4xf32> to vector<8x1xf32>
    %13 = vector.extract_strided_slice %6 {offsets = [1, 0], sizes = [1, 256], strides = [1, 1]} : vector<4x256xf32> to vector<1x256xf32>
    %14 = vector.broadcast %12 : vector<8x1xf32> to vector<8x256xf32>
    %15 = vector.broadcast %13 : vector<1x256xf32> to vector<8x256xf32>
    %16 = arith.mulf %14, %15 : vector<8x256xf32>
    %17 = arith.addf %11, %16 : vector<8x256xf32>
    %18 = vector.extract_strided_slice %1 {offsets = [0, 2], sizes = [8, 1], strides = [1, 1]} : vector<8x4xf32> to vector<8x1xf32>
    %19 = vector.extract_strided_slice %6 {offsets = [2, 0], sizes = [1, 256], strides = [1, 1]} : vector<4x256xf32> to vector<1x256xf32>
    %20 = vector.broadcast %18 : vector<8x1xf32> to vector<8x256xf32>
    %21 = vector.broadcast %19 : vector<1x256xf32> to vector<8x256xf32>
    %22 = arith.mulf %20, %21 : vector<8x256xf32>
    %23 = arith.addf %17, %22 : vector<8x256xf32>
    %24 = vector.extract_strided_slice %1 {offsets = [0, 3], sizes = [8, 1], strides = [1, 1]} : vector<8x4xf32> to vector<8x1xf32>
    %25 = vector.extract_strided_slice %6 {offsets = [3, 0], sizes = [1, 256], strides = [1, 1]} : vector<4x256xf32> to vector<1x256xf32>
    %26 = vector.broadcast %24 : vector<8x1xf32> to vector<8x256xf32>
    %27 = vector.broadcast %25 : vector<1x256xf32> to vector<8x256xf32>
    %28 = arith.mulf %26, %27 : vector<8x256xf32>
    %29 = arith.addf %23, %28 : vector<8x256xf32>
    %30 = vector.broadcast %0 : vector<8x1xf32> to vector<8x256xf32>
    %31 = arith.addf %29, %30 : vector<8x256xf32>
    %32 = arith.index_cast %3 : i32 to index
    %c0_6 = arith.constant 0 : index
    %c0_7 = arith.constant 0 : index
    %33 = vector.load %arg5[%32, %c0_6, %c0_7] : memref<1x8x256xf32, #tpu.memory_space<vmem>>, vector<1x8x256xf32>
    %34 = vector.shape_cast %33 : vector<1x8x256xf32> to vector<8x256xf32>
    %35 = vector.shape_cast %31 : vector<8x256xf32> to vector<1x8x256xf32>
    tpu.vector_store %arg5[%32, %c0_6, %c0_7], %35 {strides = array<i32>} : memref<1x8x256xf32, #tpu.memory_space<vmem>>, vector<1x8x256xf32>,
    %c1_i32_8 = arith.constant 1 : i32
    return
  }
  func.func @transform_0(%arg0: i32, %arg1: i32) -> (i32, i32, i32) {
    %c0_i32 = arith.constant 0 : i32
    %c0_i32_0 = arith.constant 0 : i32
    return %arg0, %c0_i32, %arg1 : i32, i32, i32
  }
  func.func @transform_1(%arg0: i32, %arg1: i32) -> (i32, i32) {
    %c0_i32 = arith.constant 0 : i32
    %c0_i32_0 = arith.constant 0 : i32
    %c0_i32_1 = arith.constant 0 : i32
    return %c0_i32, %c0_i32_0 : i32, i32
  }
  func.func @transform_2(%arg0: i32, %arg1: i32) -> (i32, i32) {
    %c0_i32 = arith.constant 0 : i32
    %c0_i32_0 = arith.constant 0 : i32
    %c0_i32_1 = arith.constant 0 : i32
    return %c0_i32, %c0_i32_0 : i32, i32
  }
  func.func @transform_3(%arg0: i32, %arg1: i32) -> (i32, i32, i32) {
    %c0_i32 = arith.constant 0 : i32
    %c0_i32_0 = arith.constant 0 : i32
    return %arg0, %c0_i32, %arg1 : i32, i32, i32
  }
}

</mosaic_0001>

<bundles_post_ra>
// kernel: tpu_custom_call.1
= control target key start
LH: loop header
LB: loop body
LE: loop exit
PB: predicated region body
PF: predicated region fallthrough
CT: control target
= control target key end

     0   :  { %8 = vsyncpa [#allocation3], 0  ;;  %s707_s0 = inlined_call_operand.vmem [shape: f32[2,4,256], index: 0, kind: input, shape index: {}]   ;;  %s708_s1 = inlined_call_operand.vmem [shape: f32[8,4], index: 1, kind: input, shape index: {}]   ;;  %s709_s2 = inlined_call_operand.vmem [shape: f32[8,1], index: 2, kind: input, shape index: {}]   ;;  %s710_s3 = inlined_call_operand.hbm [shape: f32[2,8,256], index: 3, kind: output, shape index: {}]  }
   0x1   :  { %10 = vsyncpa [#allocation3 + $0x1], 0  ;;  %s592_s12 = smov 0   ;;  %s594_s13 = smov 0  }
   0x2   :  { %s596_s14 = smov 0   ;;  %s598_s15 = smov 0  }
   0x3   :  { %s600_s16 = smov 0   ;;  %s602_s17 = smov 0  }
   0x4 LB: > { %s409_s18 = sadd.s32 4294967295, %s565_s17   ;;  %s410_s19 = sadd.s32 4294967294, %s565_s17   ;;  %s565_s17 = sphi %s602_s17, %s16_s17   ;;  %s561_s16 = sphi %s600_s16, %s717_s16   ;;  %s557_s15 = sphi %s598_s15, %s716_s15   ;;  %s553_s14 = sphi %s596_s14, %s715_s14   ;;  %s549_s13 = sphi %s594_s13, %s714_s13   ;;  %s545_s12 = sphi %s592_s12, %s713_s12  }
   0x5   : > { %s28_s20 = sadd.s32 1, %s561_s16  ;;  %s107_s21 = sadd.s32 1, %s553_s14 }
   0x6   : > { %p30_p0 = scmp.ge.s32.totalorder %s28_s20, 2  ;;  %p117_p1 = scmp.ne.s32.totalorder %s553_s14, %s549_s13 }
   0x7   : > { %p118_p2 = scmp.eq.s32.totalorder %s409_s18, 1  ;;  %p123_p3 = scmp.ne.s32.totalorder %s549_s13, %s545_s12 }
   0x8   : > { %s719_s20 = smov (%p30_p0, %s28_s20), 0  ;;  %p124_p5 = scmp.eq.s32.totalorder %s410_s19, 1 }
   0x9   : > { %p632_p4 = por %p118_p2, %p117_p1  ;;  %s102_s23 = ssub.s32 %s561_s16, %s719_s20 }
   0xa   : > { %p413_p6 = scmp.ge.s32.totalorder %s565_s17, 1  ;;  %p105_p7 = scmp.eq.s32.totalorder %s102_s23, 0 }
   0xb   : > { %p639_p8 = por %p124_p5, %p123_p3  ;;  %p161_p9 = scmp.lt.s32.totalorder %s565_s17, 3 }
   0xc   : > { %s645_s25 = scalar_select %p105_p7, %s553_s14, %s107_s21  }
   0xd   : > { %p162_p10 = pnand %p413_p6, %p161_p9 }
   0xe   : > { %p190_p11 = scmp.lt.s32.totalorder (!%p162_p10), %s557_s15, 1  ;;  %s186_s8 = sand.u32 (!%p162_p10), 1, %s549_s13  }
   0xf   : > { %165 = sbr.rel (%p162_p10) target bundleno = 174 (0xae), region = 32  ;;  %s414_s9 = sshll.u32 (!%p162_p10), %s186_s8, 4 }
  0x10   : > { %s423_s10 = sshll.u32 (!%p162_p10), %s557_s15, 8  ;;  %s188_s11 = scalar_lea.vmem (!%p162_p10), [#allocation2], %s414_s9 }
  0x11   : > { %s333_s18 = sshll.u32 (!%p162_p10), %s188_s11, 4  ;;  %s665_s23 = scalar_lea.hbm (!%p162_p10), %s710_s3, %s423_s10  ;;  %s334_s18 = int_to_ptr.vmem [resolvable:$true] %s333_s18 }
  0x12   : > { %s317_s26 = scalar_lea.sflag (!%p162_p10), [#allocation3], %s186_s8  ;;  %s489_s27 = scalar_lea.vmem (!%p162_p10), %s334_s18, 256 }
  0x13   : > { %p490_p12 = scmp.ne.s32.totalorder (!%p162_p10), %s334_s18, %s489_s27 }
  0x14   : > { %v201_v0 = vld [vmem:[%s708_s1] sm:$0xff]  ;;  %v567_v1 = vmov 0   ;;  %v568_v2 = vmov 2   ;;  %v569_v3 = vmov 1   ;;  %v570_v4 = vmov 3   ;;  %s191_s30 = scalar_select %p190_p11, %s557_s15, 1 }
  0x15   : > { %483 = vset.pattern.permute.xlu0 %v567_v1  ;;  %485 = vset.pattern.permute.xlu1 %v568_v2  ;;  %v200_v5 = vld [vmem:[%s709_s2] sm:$0xff]  ;;  %v209_v6 = vlaneseq  ;;  %p491_p13 = pnand %p490_p12, %p632_p4  ;;  %s571_s15 = smov [#allocation2]  }
  0x16   : > { %205 = vperm.xlu0 %483, %v201_v0   ;;  %256 = vperm.xlu1 %485, %v201_v0   ;;  %s422_s4 = sshll.u32 %s191_s30, 3  ;;  %s493_s28 = sshll.u32 %s571_s15, 4  ;;  %s494_s28 = int_to_ptr.vmem [resolvable:$false] %s493_s28 }
  0x17   : > { %v210_v7 = vshrl.u32 %v209_v6, 7  ;;  %s197_s7 = scalar_lea.vmem %s707_s0, %s422_s4  ;;  %p492_p0 = pneg %p491_p13 }
  0x18   : > { %v202_v12 = vld [vmem:[%s197_s7] sm:$0xff]  ;;  %s495_s29 = scalar_lea.vmem %s494_s28, 512  ;;  %p496_p1 = scmp.lt.s32.totalorder %s334_s18, %s494_s28 }
  0x19   : > { %v211_v8 = vsub.s32 0, %v210_v7  ;;  %v215_v9 = vsub.s32 4, %v210_v7  ;;  %v235_v10 = vsub.s32 1, %v210_v7  ;;  %v239_v11 = vsub.s32 5, %v210_v7  ;;  %p497_p2 = scmp.lt.s32.totalorder %s495_s29, %s489_s27 }
  0x1a   : > { %484 = vset.pattern.permute.xlu0 %v569_v3  ;;  %486 = vset.pattern.permute.xlu1 %v570_v4  ;;  %v261_v13 = vsub.s32 2, %v210_v7  ;;  %v265_v14 = vsub.s32 6, %v210_v7  ;;  %v287_v15 = vsub.s32 3, %v210_v7  ;;  %v291_v16 = vsub.s32 7, %v210_v7 }
  0x1b   : > { %230 = vperm.xlu0 %484, %v201_v0   ;;  %282 = vperm.xlu1 %486, %v201_v0   ;;  %v212_v17 = vrot.slane %v202_v12, %v211_v8  ;;  %v216_v18 = vrot.slane %v202_v12, %v215_v9  ;;  %v236_v19 = vrot.slane %v202_v12, %v235_v10  ;;  %p498_p3 = por %p497_p2, %p496_p1 }
  0x1c   : > { %v240_v20 = vrot.slane %v202_v12, %v239_v11  ;;  %v262_v21 = vrot.slane %v202_v12, %v261_v13  ;;  %v266_v22 = vrot.slane %v202_v12, %v265_v14  ;;  %v288_v25 = vrot.slane %v202_v12, %v287_v15 }
  0x1d   : > { %v292_v26 = vrot.slane %v202_v12, %v291_v16  ;;  %v222_v27 = vrot.slane %v212_v17, %v211_v8  ;;  %v226_v28 = vrot.slane %v216_v18, %v211_v8  ;;  %v246_v29 = vrot.slane %v236_v19, %v235_v10  ;;  %p499_p5 = pnand %p498_p3, %p492_p0 }
  0x1e   : > { %v250_v30 = vrot.slane %v240_v20, %v235_v10  ;;  %v272_v31 = vrot.slane %v262_v21, %v261_v13  ;;  %v276_v32 = vrot.slane %v266_v22, %v261_v13  ;;  %v298_v33 = vrot.slane %v288_v25, %v287_v15 }
  0x1f   : > { %487 = vset.pattern.permute.xlu1 %v567_v1  ;;  %488 = vset.pattern.permute.xlu0 %v567_v1  ;;  %v302_v34 = vrot.slane %v292_v26, %v287_v15 }
  0x20   : > { %309 = vperm.xlu1 %487, %v200_v5  }
  0x91   : > { %v206_v23 = vpop.permute.xlu0 %205  ;;  %v257_v24 = vpop.permute.xlu1 %256 }
  0x92   : > { %v227_v37 = vmul.f32 %v222_v27, %v206_v23  ;;  %v228_v38 = vmul.f32 %v226_v28, %v206_v23  ;;  %v277_v41 = vmul.f32 %v272_v31, %v257_v24  ;;  %v278_v42 = vmul.f32 %v276_v32, %v257_v24 }
  0x96   : > { %v231_v35 = vpop.permute.xlu0 %230  ;;  %v283_v36 = vpop.permute.xlu1 %282 }
  0x97   : > { %v251_v39 = vmul.f32 %v246_v29, %v231_v35  ;;  %v252_v40 = vmul.f32 %v250_v30, %v231_v35  ;;  %v303_v45 = vmul.f32 %v298_v33, %v283_v36  ;;  %v304_v46 = vmul.f32 %v302_v34, %v283_v36 }
  0x99   : > { %v253_v43 = vadd.f32 %v251_v39, %v227_v37  ;;  %v254_v44 = vadd.f32 %v252_v40, %v228_v38 }
  0x9b   : > { %v279_v47 = vadd.f32 %v277_v41, %v253_v43  ;;  %v280_v48 = vadd.f32 %v278_v42, %v254_v44  ;;  %v310_v49 = vpop.permute.xlu1 %309 }
  0x9d   : > { %v305_v50 = vadd.f32 %v303_v45, %v279_v47  ;;  %v306_v51 = vadd.f32 %v304_v46, %v280_v48 }
  0x9f   : > { %v312_v52 = vadd.f32 %v310_v49, %v305_v50  ;;  %v313_v53 = vadd.f32 %v310_v49, %v306_v51 }
  0xa1   : > { %314 = vst [vmem:[%s188_s11] sm:$0xff] %v312_v52  ;;  %315 = vst [vmem:[%s188_s11 + $0x8] sm:$0xff] %v313_v53 }
  0xa2   : > { %502 = shalt.err (!%p499_p5)
}
  0xa3   : > { %s503_s30 = scalar_lea.hbm %s665_s23, 256  ;;  %s507_s6 = scalar_lea.hbm %s710_s3, 512 }
  0xa4   : > { %p504_p6 = scmp.ne.s32.totalorder %s665_s23, %s503_s30  ;;  %p508_p10 = scmp.lt.s32.totalorder %s665_s23, %s710_s3 }
  0xa5   : > { %p509_p11 = scmp.lt.s32.totalorder %s507_s6, %s503_s30 }
  0xa6   : > { %p505_p7 = pnand %p504_p6, %p632_p4 }
  0xa7   : > { %p510_p12 = por %p509_p11, %p508_p10 }
  0xa8   : > { %p506_p9 = pneg %p505_p7 }
  0xaa   : > { %p511_p13 = pnand %p510_p12, %p506_p9 }
  0xac   : > { %514 = shalt.err (!%p511_p13)
}
  0xad   : > { %424 = dma.vmem_to_hbm [thread:$0]  (%p632_p4), %s334_s18, 256, %s665_s23, %s317_s26  }
  0xae PF: > { %p430_p0 = scmp.ge.s32.totalorder %s565_s17, 2  ;;  %s345_s9 = sand.u32 1, %s545_s12  }
  0xaf   : > { %s346_s10 = scalar_lea.sflag [#allocation3], %s345_s9 }
  0xb0   : > { %p427_p1 = pnand %p430_p0, %p639_p8 }
  0xb2   : > { %p428_p2 = pneg %p427_p1 }
  0xb4   : > { %540 = dma.done.wait (%p428_p2), %s346_s10, 256  }
  0xb5   : > { %542 = vsyncadd (%p428_p2), %s346_s10, 4294967040  ;;  %s16_s17 = sadd.s32 1, %s565_s17   ;;  %s713_s12 = smov %s549_s13 }
  0xb6   : > { %p13_p3 = scmp.ge.s32.totalorder %s16_s17, 4   ;;  %s714_s13 = smov %s553_s14 }
  0xb7   : > { %s715_s14 = smov %s645_s25  ;;  %s716_s15 = smov %s561_s16 }
  0xb8   : > { %s717_s16 = smov %s719_s20  ;;  %15 = sbr.rel (!%p13_p3) target bundleno = 4 (0x4), region = 67 }
  0xbd   :  { %351 = vsyncpa [#allocation3], 1 }
  0xbe   :  { %353 = vsyncpa [#allocation3 + $0x1], 1 }

</bundles_post_ra>
